<compile_context>
chip_gen: v5e
topology: v5e:2x2
jax: 0.10.0
libtpu: 0.0.40
codegen_flags: <defaults>
</compile_context>

<pallas_src>
import functools

import jax
import jax.numpy as jnp
from jax.experimental import pallas as pl
from jax.experimental.pallas import tpu as pltpu

# ----- problem sizes (consistent with the module's forward) -----
B = 2                         # batch
F = 16                        # input_dim (features per example)
C = 32                        # conv out_channels (fixed by the module)
K = 3                         # conv kernel_size (fixed by the module)
L_OUT = F - (K - 1)           # 14, conv output length
L_POOL = L_OUT // 2           # 7,  after MaxPool1d(2)
H = 64                        # hidden_dim (module default)
O = 4                         # output_dim (num classes)
PC = L_POOL * C               # 224, flattened pooled feature length


def _round_up(n, m):
    return ((n + m - 1) // m) * m


def simple_cnn_kernel(x_ref, we_ref, wo_ref, bc_ref, w1_ref, b1_ref, w2_ref, b2_ref, out_ref):
    """Whole forward pass fused into one kernel body (per batch tile).

    x_ref : (TB, F)    input features
    we_ref: (F, PC)    im2col conv weights for even conv time-steps, flatten order (p*C + c)
    wo_ref: (F, PC)    im2col conv weights for odd  conv time-steps, flatten order (p*C + c)
    bc_ref: (1, PC)    conv bias tiled over pool positions
    w1_ref: (PC, H)    fc1 weight reordered to match PyTorch's channel-major flatten
    b1_ref: (1, H)     fc1 bias
    w2_ref: (H, O)     fc2 weight transposed
    b2_ref: (1, O)     fc2 bias
    out_ref: (TB, O)   logits
    """
    x = x_ref[...]                                                         # (TB, F)

    # Conv1d expressed as two dense matmuls (even / odd conv time-steps).
    ce = jnp.dot(x, we_ref[...], preferred_element_type=jnp.float32)       # (TB, PC)
    co = jnp.dot(x, wo_ref[...], preferred_element_type=jnp.float32)       # (TB, PC)

    # MaxPool1d(2) = elementwise max of the two slabs; bias-add + ReLU commute with it.
    pooled = jnp.maximum(jnp.maximum(ce, co) + bc_ref[...], 0.0)           # (TB, PC)

    # fc1 (single fused 224-deep contraction) -> ReLU -> fc2.
    h = jnp.maximum(
        jnp.dot(pooled, w1_ref[...], preferred_element_type=jnp.float32) + b1_ref[...], 0.0)
    out = jnp.dot(h, w2_ref[...], preferred_element_type=jnp.float32) + b2_ref[...]
    out_ref[...] = out.astype(out_ref.dtype)


def prepare_params(w_conv, b_conv, w_fc1, b_fc1, w_fc2, b_fc2):
    """One-time weight re-layout (hoisted out of the per-call hot path).

    Takes PyTorch-shaped parameters:
      w_conv (C, 1, K), b_conv (C,), w_fc1 (H, C*L_POOL), b_fc1 (H,), w_fc2 (O, H), b_fc2 (O,)
    """
    wc = w_conv[:, 0, :].astype(jnp.float32)                  # (C, K)

    # Build im2col conv matrices in flatten order (p*C + c):
    #   W_even[2p + k,   p*C + c] = wc[c, k]   (conv time-step t = 2p)
    #   W_odd [2p + 1 + k, p*C + c] = wc[c, k] (conv time-step t = 2p + 1)
    w_even = jnp.zeros((F, L_POOL, C), jnp.float32)
    w_odd = jnp.zeros((F, L_POOL, C), jnp.float32)
    p_idx = jnp.arange(L_POOL)
    for k in range(K):
        tap = jnp.broadcast_to(wc[:, k], (L_POOL, C))         # (L_POOL, C)
        w_even = w_even.at[2 * p_idx + k, p_idx, :].set(tap)
        w_odd = w_odd.at[2 * p_idx + 1 + k, p_idx, :].set(tap)
    w_even = w_even.reshape(F, PC)
    w_odd = w_odd.reshape(F, PC)

    bc = jnp.tile(b_conv.astype(jnp.float32), L_POOL)[None, :]             # (1, PC)

    # fc1 weight: PyTorch flatten index is c*L_POOL + p; our pooled index is p*C + c.
    w1 = jnp.transpose(w_fc1.astype(jnp.float32).reshape(H, C, L_POOL), (2, 1, 0)).reshape(PC, H)
    b1 = b_fc1.astype(jnp.float32)[None, :]                                # (1, H)
    w2 = jnp.transpose(w_fc2.astype(jnp.float32), (1, 0))                  # (H, O)
    b2 = b_fc2.astype(jnp.float32)[None, :]                                # (1, O)

    return (w_even, w_odd, bc, w1, b1, w2, b2)


def simple_cnn_forward(x, params, *, block_b=None):
    """Runs the fused Pallas kernel, tiling the batch axis with a parallel grid."""
    we, wo, bc, w1, b1, w2, b2 = params
    b = x.shape[0]
    if block_b is None:
        block_b = min(128, _round_up(b, 8))    # sublane-aligned; 128-row blocks for real batches
    b_pad = _round_up(b, block_b)
    if b_pad != b:
        x = jnp.pad(x, ((0, b_pad - b), (0, 0)))

    grid = (b_pad // block_b,)
    full = lambda i: (0, 0)        # weights stay resident across batch blocks

    out = pl.pallas_call(
        simple_cnn_kernel,
        out_shape=jax.ShapeDtypeStruct((b_pad, O), jnp.float32),
        grid=grid,
        in_specs=[
            pl.BlockSpec((block_b, F), lambda i: (i, 0)),
            pl.BlockSpec((F, PC), full),
            pl.BlockSpec((F, PC), full),
            pl.BlockSpec((1, PC), full),
            pl.BlockSpec((PC, H), full),
            pl.BlockSpec((1, H), full),
            pl.BlockSpec((H, O), full),
            pl.BlockSpec((1, O), full),
        ],
        # NOTE: O=4 (<128 lanes) means a masked partial store per block; irrelevant at this
        # size, pad O / widen the output slab if per-step stores ever dominate.
        out_specs=pl.BlockSpec((block_b, O), lambda i: (i, 0)),
        compiler_params=pltpu.CompilerParams(dimension_semantics=("parallel",)),
    )(x, we, wo, bc, w1, b1, w2, b2)
    return out[:b]


def simple_cnn_reference(x, w_conv, b_conv, w_fc1, b_fc1, w_fc2, b_fc2):
    """Pure-JAX replica of the PyTorch forward (for correctness check)."""
    wc = w_conv[:, 0, :]                                                    # (C, K)
    patches = jnp.stack([x[:, k:k + L_OUT] for k in range(K)], axis=-1)     # (B, L_OUT, K)
    conv = jnp.einsum("blk,ck->bcl", patches, wc) + b_conv[None, :, None]   # (B, C, L_OUT)
    conv = jnp.maximum(conv, 0.0)
    pooled = conv[:, :, :2 * L_POOL].reshape(x.shape[0], C, L_POOL, 2).max(axis=-1)
    flat = pooled.reshape(x.shape[0], C * L_POOL)                           # channel-major flatten
    h = jnp.maximum(flat @ w_fc1.T + b_fc1, 0.0)
    return h @ w_fc2.T + b_fc2


if __name__ == "__main__":
    key = jax.random.PRNGKey(0)
    kx, k1, k2, k3, k4, k5, k6 = jax.random.split(key, 7)

    x = jax.random.normal(kx, (B, F), dtype=jnp.float32)

    # Deterministic synthetic parameters (PyTorch __init__ shapes).
    w_conv = jax.random.normal(k1, (C, 1, K), dtype=jnp.float32) * 0.1
    b_conv = jax.random.normal(k2, (C,), dtype=jnp.float32) * 0.1
    w_fc1 = jax.random.normal(k3, (H, C * L_POOL), dtype=jnp.float32) * 0.05
    b_fc1 = jax.random.normal(k4, (H,), dtype=jnp.float32) * 0.05
    w_fc2 = jax.random.normal(k5, (O, H), dtype=jnp.float32) * 0.1
    b_fc2 = jax.random.normal(k6, (O,), dtype=jnp.float32) * 0.1

    # Weight re-layout done ONCE, outside the hot path.
    params = prepare_params(w_conv, b_conv, w_fc1, b_fc1, w_fc2, b_fc2)
    params = tuple(jax.block_until_ready(p) for p in params)

    fwd = jax.jit(functools.partial(simple_cnn_forward))
    out = jax.block_until_ready(fwd(x, params))

    ref = simple_cnn_reference(x, w_conv, b_conv, w_fc1, b_fc1, w_fc2, b_fc2)
    assert out.shape == (B, O)
    assert jnp.allclose(out, ref, atol=1e-4, rtol=1e-4), (out, ref)

    print("KERNEL_OK")
</pallas_src>

<mosaic_0001>
module attributes {stable_mosaic.version = 11 : i64} {
  func.func @simple_cnn_kernel(%arg0: i32, %arg1: memref<8x16xf32, #tpu.memory_space<vmem>>, %arg2: memref<16x224xf32, #tpu.memory_space<vmem>>, %arg3: memref<16x224xf32, #tpu.memory_space<vmem>>, %arg4: memref<1x224xf32, #tpu.memory_space<vmem>>, %arg5: memref<224x64xf32, #tpu.memory_space<vmem>>, %arg6: memref<1x64xf32, #tpu.memory_space<vmem>>, %arg7: memref<64x4xf32, #tpu.memory_space<vmem>>, %arg8: memref<1x4xf32, #tpu.memory_space<vmem>>, %arg9: memref<8x4xf32, #tpu.memory_space<vmem>>) attributes {dimension_semantics = [#tpu.dimension_semantics<parallel>], iteration_bounds = array<i64: 1>, scalar_prefetch = 0 : i64, scratch_operands = 0 : i64, tpu.core_type = #tpu.core_type<tc>, window_params = [{transform_indices = @transform_0, window_bounds = array<i64: 8, 16>}, {pipeline_mode = #tpu.pipeline_mode<synchronous>, transform_indices = @transform_1, window_bounds = array<i64: 16, 224>}, {pipeline_mode = #tpu.pipeline_mode<synchronous>, transform_indices = @transform_2, window_bounds = array<i64: 16, 224>}, {pipeline_mode = #tpu.pipeline_mode<synchronous>, transform_indices = @transform_3, window_bounds = array<i64: 1, 224>}, {pipeline_mode = #tpu.pipeline_mode<synchronous>, transform_indices = @transform_4, window_bounds = array<i64: 224, 64>}, {pipeline_mode = #tpu.pipeline_mode<synchronous>, transform_indices = @transform_5, window_bounds = array<i64: 1, 64>}, {pipeline_mode = #tpu.pipeline_mode<synchronous>, transform_indices = @transform_6, window_bounds = array<i64: 64, 4>}, {pipeline_mode = #tpu.pipeline_mode<synchronous>, transform_indices = @transform_7, window_bounds = array<i64: 1, 4>}, {transform_indices = @transform_8, window_bounds = array<i64: 8, 4>}]} {
    %c0 = arith.constant 0 : index
    %c0_0 = arith.constant 0 : index
    %0 = vector.load %arg1[%c0, %c0_0] : memref<8x16xf32, #tpu.memory_space<vmem>>, vector<8x16xf32>
    %c0_1 = arith.constant 0 : index
    %c0_2 = arith.constant 0 : index
    %1 = vector.load %arg2[%c0_1, %c0_2] : memref<16x224xf32, #tpu.memory_space<vmem>>, vector<16x224xf32>
    %cst = arith.constant dense<0.000000e+00> : vector<8x224xf32>
    %2 = tpu.matmul %0, %1, %cst {dimension_numbers = #tpu.dot_dimension_numbers<[1], [0], [0], [1], [0, 0, 1, 1], [], []>} : vector<8x16xf32>, vector<16x224xf32>, vector<8x224xf32> -> vector<8x224xf32>
    %c0_3 = arith.constant 0 : index
    %c0_4 = arith.constant 0 : index
    %3 = vector.load %arg3[%c0_3, %c0_4] : memref<16x224xf32, #tpu.memory_space<vmem>>, vector<16x224xf32>
    %cst_5 = arith.constant dense<0.000000e+00> : vector<8x224xf32>
    %4 = tpu.matmul %0, %3, %cst_5 {dimension_numbers = #tpu.dot_dimension_numbers<[1], [0], [0], [1], [0, 0, 1, 1], [], []>} : vector<8x16xf32>, vector<16x224xf32>, vector<8x224xf32> -> vector<8x224xf32>
    %5 = arith.maximumf %2, %4 : vector<8x224xf32>
    %c0_6 = arith.constant 0 : index
    %c0_7 = arith.constant 0 : index
    %6 = vector.load %arg4[%c0_6, %c0_7] : memref<1x224xf32, #tpu.memory_space<vmem>>, vector<1x224xf32>
    %7 = vector.broadcast %6 : vector<1x224xf32> to vector<8x224xf32>
    %8 = arith.addf %5, %7 : vector<8x224xf32>
    %cst_8 = arith.constant 0.000000e+00 : f32
    %9 = vector.broadcast %cst_8 : f32 to vector<8x224xf32>
    %10 = arith.maximumf %8, %9 : vector<8x224xf32>
    %c0_9 = arith.constant 0 : index
    %c0_10 = arith.constant 0 : index
    %11 = vector.load %arg5[%c0_9, %c0_10] : memref<224x64xf32, #tpu.memory_space<vmem>>, vector<224x64xf32>
    %cst_11 = arith.constant dense<0.000000e+00> : vector<8x64xf32>
    %12 = tpu.matmul %10, %11, %cst_11 {dimension_numbers = #tpu.dot_dimension_numbers<[1], [0], [0], [1], [0, 0, 1, 1], [], []>} : vector<8x224xf32>, vector<224x64xf32>, vector<8x64xf32> -> vector<8x64xf32>
    %c0_12 = arith.constant 0 : index
    %c0_13 = arith.constant 0 : index
    %13 = vector.load %arg6[%c0_12, %c0_13] : memref<1x64xf32, #tpu.memory_space<vmem>>, vector<1x64xf32>
    %14 = vector.broadcast %13 : vector<1x64xf32> to vector<8x64xf32>
    %15 = arith.addf %12, %14 : vector<8x64xf32>
    %cst_14 = arith.constant 0.000000e+00 : f32
    %16 = vector.broadcast %cst_14 : f32 to vector<8x64xf32>
    %17 = arith.maximumf %15, %16 : vector<8x64xf32>
    %c0_15 = arith.constant 0 : index
    %c0_16 = arith.constant 0 : index
    %18 = vector.load %arg7[%c0_15, %c0_16] : memref<64x4xf32, #tpu.memory_space<vmem>>, vector<64x4xf32>
    %cst_17 = arith.constant dense<0.000000e+00> : vector<8x4xf32>
    %19 = tpu.matmul %17, %18, %cst_17 {dimension_numbers = #tpu.dot_dimension_numbers<[1], [0], [0], [1], [0, 0, 1, 1], [], []>} : vector<8x64xf32>, vector<64x4xf32>, vector<8x4xf32> -> vector<8x4xf32>
    %c0_18 = arith.constant 0 : index
    %c0_19 = arith.constant 0 : index
    %20 = vector.load %arg8[%c0_18, %c0_19] : memref<1x4xf32, #tpu.memory_space<vmem>>, vector<1x4xf32>
    %21 = vector.broadcast %20 : vector<1x4xf32> to vector<8x4xf32>
    %22 = arith.addf %19, %21 : vector<8x4xf32>
    %c0_20 = arith.constant 0 : index
    %c0_21 = arith.constant 0 : index
    %23 = vector.load %arg9[%c0_20, %c0_21] : memref<8x4xf32, #tpu.memory_space<vmem>>, vector<8x4xf32>
    tpu.vector_store %arg9[%c0_20, %c0_21], %22 {strides = array<i32>} : memref<8x4xf32, #tpu.memory_space<vmem>>, vector<8x4xf32>,
    return
  }
  func.func @transform_0(%arg0: i32) -> (i32, i32) {
    %c0_i32 = arith.constant 0 : i32
    %c0_i32_0 = arith.constant 0 : i32
    return %arg0, %c0_i32 : i32, i32
  }
  func.func @transform_1(%arg0: i32) -> (i32, i32) {
    %c0_i32 = arith.constant 0 : i32
    %c0_i32_0 = arith.constant 0 : i32
    %c0_i32_1 = arith.constant 0 : i32
    return %c0_i32, %c0_i32_0 : i32, i32
  }
  func.func @transform_2(%arg0: i32) -> (i32, i32) {
    %c0_i32 = arith.constant 0 : i32
    %c0_i32_0 = arith.constant 0 : i32
    %c0_i32_1 = arith.constant 0 : i32
    return %c0_i32, %c0_i32_0 : i32, i32
  }
  func.func @transform_3(%arg0: i32) -> (i32, i32) {
    %c0_i32 = arith.constant 0 : i32
    %c0_i32_0 = arith.constant 0 : i32
    %c0_i32_1 = arith.constant 0 : i32
    return %c0_i32, %c0_i32_0 : i32, i32
  }
  func.func @transform_4(%arg0: i32) -> (i32, i32) {
    %c0_i32 = arith.constant 0 : i32
    %c0_i32_0 = arith.constant 0 : i32
    %c0_i32_1 = arith.constant 0 : i32
    return %c0_i32, %c0_i32_0 : i32, i32
  }
  func.func @transform_5(%arg0: i32) -> (i32, i32) {
    %c0_i32 = arith.constant 0 : i32
    %c0_i32_0 = arith.constant 0 : i32
    %c0_i32_1 = arith.constant 0 : i32
    return %c0_i32, %c0_i32_0 : i32, i32
  }
  func.func @transform_6(%arg0: i32) -> (i32, i32) {
    %c0_i32 = arith.constant 0 : i32
    %c0_i32_0 = arith.constant 0 : i32
    %c0_i32_1 = arith.constant 0 : i32
    return %c0_i32, %c0_i32_0 : i32, i32
  }
  func.func @transform_7(%arg0: i32) -> (i32, i32) {
    %c0_i32 = arith.constant 0 : i32
    %c0_i32_0 = arith.constant 0 : i32
    %c0_i32_1 = arith.constant 0 : i32
    return %c0_i32, %c0_i32_0 : i32, i32
  }
  func.func @transform_8(%arg0: i32) -> (i32, i32) {
    %c0_i32 = arith.constant 0 : i32
    %c0_i32_0 = arith.constant 0 : i32
    return %arg0, %c0_i32 : i32, i32
  }
}

</mosaic_0001>

<bundles_post_ra>
// kernel: simple_cnn_forward.1
= control target key start
LH: loop header
LB: loop body
LE: loop exit
PB: predicated region body
PF: predicated region fallthrough
CT: control target
= control target key end

     0   :  { %vm34_vm0 = vcmask 130048   ;;  %vm166_vm1 = vcmask 785408   ;;  %vm223_vm2 = vcmask 523264   ;;  %vm247_vm3 = vcmask 31744   ;;  %s457_s1 = inlined_call_operand.vmem [shape: f32[16,224], index: 1, kind: input, shape index: {}]   ;;  %s458_s2 = inlined_call_operand.vmem [shape: f32[16,224], index: 2, kind: input, shape index: {}]   ;;  %s459_s0 = inlined_call_operand.vmem [shape: f32[8,16], index: 0, kind: input, shape index: {}]   ;;  %s460_s4 = inlined_call_operand.vmem [shape: f32[224,64], index: 4, kind: input, shape index: {}]   ;;  %s461_s5 = inlined_call_operand.vmem [shape: f32[1,64], index: 5, kind: input, shape index: {}]   ;;  %s462_s6 = inlined_call_operand.vmem [shape: f32[64,4], index: 6, kind: input, shape index: {}]   ;;  %s463_s3 = inlined_call_operand.vmem [shape: f32[1,224], index: 3, kind: input, shape index: {}]   ;;  %s464_s7 = inlined_call_operand.vmem [shape: f32[1,4], index: 7, kind: input, shape index: {}]   ;;  %s465_s8 = inlined_call_operand.vmem [shape: f32[8,4], index: 8, kind: output, shape index: {}]  }
   0x1   :  { %v32_v0 = vld [vmem:[%s457_s1 + $0x10] sm:$0xff]  ;;  %v30_v2 = vld [vmem:[%s457_s1] sm:$0xff]  ;;  %v81_v5 = vld [vmem:[%s458_s2 + $0x18] sm:$0xff] }
   0x2   :  { %v80_v1 = vld [vmem:[%s458_s2 + $0x10] sm:$0xff]  ;;  %52 = vmatpush.msra.mxu3 %v32_v0  ;;  %v78_v3 = vld [vmem:[%s458_s2] sm:$0xff]  ;;  %v33_v6 = vld [vmem:[%s457_s1 + $0x18] sm:$0xff] }
   0x3   :  { %96 = vmatpush.msra.mxu2 %v80_v1  ;;  %v29_v4 = vld [vmem:[%s459_s0] sm:$0xff]  ;;  %v149_v7 = vld [vmem:[%s460_s4 + $0x78] sm:$0xff]  ;;  %v79_v8 = vld [vmem:[%s458_s2 + $0x8] sm:$0xff]  ;;  %72 = vmatpush.msra.mxu1 %v33_v6 }
   0x4   :  { %53 = vmatpush.msra.mxu3 %v30_v2  ;;  %v31_v9 = vld [vmem:[%s457_s1 + $0x8] sm:$0xff]  ;;  %v148_v10 = vld [vmem:[%s460_s4 + $0x70] sm:$0xff]  ;;  %170 = vmatpush.msra.mxu0 %v149_v7  ;;  %v161_v11 = vld [vmem:[%s460_s4 + $0xd8] sm:$0xff] }
   0x5   :  { %97 = vmatpush.msra.mxu2 %v78_v3  ;;  %253 = vmatmul.msk.f32.vlgmr.msra.gmra.mxu3 %vm34_vm0, %v29_v4  ;;  %v147_v12 = vld [vmem:[%s460_s4 + $0x68] sm:$0xff]  ;;  %v160_v13 = vld [vmem:[%s460_s4 + $0xd0] sm:$0xff]  ;;  %v146_v14 = vld [vmem:[%s460_s4 + $0x60] sm:$0xff] }
   0x6   :  { %255 = vmatmul.msk.f32.vlgmr.msra.gmra.mxu2 %vm34_vm0, %v29_v4  ;;  %116 = vmatpush.msrb.mxu3 %v81_v5  ;;  %v159_v15 = vld [vmem:[%s460_s4 + $0xc8] sm:$0xff]  ;;  %v145_v16 = vld [vmem:[%s460_s4 + $0x58] sm:$0xff]  ;;  %v158_v17 = vld [vmem:[%s460_s4 + $0xc0] sm:$0xff] }
   0x7   :  { %73 = vmatpush.msra.mxu1 %v31_v9  ;;  %171 = vmatpush.msra.mxu0 %v148_v10  ;;  %v144_v18 = vld [vmem:[%s460_s4 + $0x50] sm:$0xff]  ;;  %v143_v19 = vld [vmem:[%s460_s4 + $0x48] sm:$0xff]  ;;  %v142_v20 = vld [vmem:[%s460_s4 + $0x40] sm:$0xff] }
   0x8   :  { %117 = vmatpush.msrb.mxu3 %v79_v8  ;;  %254 = vmatmul.msk.f32.vlgmr.msra.gmra.mxu1 %vm34_vm0, %v29_v4  ;;  %v141_v21 = vld [vmem:[%s460_s4 + $0x38] sm:$0xff]  ;;  %v140_v22 = vld [vmem:[%s460_s4 + $0x30] sm:$0xff]  ;;  %v139_v23 = vld [vmem:[%s460_s4 + $0x28] sm:$0xff] }
   0x9   :  { %194 = vmatpush.msrb.mxu1 %v161_v11  ;;  %172 = vmatpush.msra.mxu0 %v147_v12  ;;  %v138_v24 = vld [vmem:[%s460_s4 + $0x20] sm:$0xff]  ;;  %v137_v25 = vld [vmem:[%s460_s4 + $0x18] sm:$0xff]  ;;  %v136_v27 = vld [vmem:[%s460_s4 + $0x10] sm:$0xff] }
   0xa   :  { %v157_v26 = vld [vmem:[%s460_s4 + $0xb8] sm:$0xff]  ;;  %v156_v28 = vld [vmem:[%s460_s4 + $0xb0] sm:$0xff]  ;;  %v135_v29 = vld [vmem:[%s460_s4 + $0x8] sm:$0xff] }
   0xb   :  { %195 = vmatpush.msrb.mxu1 %v160_v13  ;;  %173 = vmatpush.msra.mxu0 %v146_v14  ;;  %v155_v30 = vld [vmem:[%s460_s4 + $0xa8] sm:$0xff]  ;;  %v134_v31 = vld [vmem:[%s460_s4] sm:$0xff]  ;;  %v153_v33 = vld [vmem:[%s460_s4 + $0x98] sm:$0xff] }
   0xc   :  { %v154_v32 = vld [vmem:[%s460_s4 + $0xa0] sm:$0xff]  ;;  %v152_v34 = vld [vmem:[%s460_s4 + $0x90] sm:$0xff]  ;;  %v151_v35 = vld [vmem:[%s460_s4 + $0x88] sm:$0xff] }
   0xd   :  { %256 = vmatmul.msk.f32.vlgmr.msrb.gmra.mxu3 %vm34_vm0, %v29_v4  ;;  %196 = vmatpush.msrb.mxu1 %v159_v15  ;;  %v150_v36 = vld [vmem:[%s460_s4 + $0x80] sm:$0xff]  ;;  %v218_v37 = vld [vmem:[%s462_s6 + $0x38] sm:$0xff]  ;;  %v217_v51 = vld [vmem:[%s462_s6 + $0x30] sm:$0xff] }
   0xe   :  { %174 = vmatpush.msra.mxu0 %v145_v16  ;;  %235 = vmatpush.msrb.mxu2 %v218_v37  ;;  %v124_v38 = vld [vmem:[%s463_s3] sm:$0x3]  ;;  %v216_v52 = vld [vmem:[%s462_s6 + $0x28] sm:$0xff]  ;;  %v214_v54 = vld [vmem:[%s462_s6 + $0x18] sm:$0xff] }
   0xf   :  { %197 = vmatpush.msrb.mxu1 %v158_v17  ;;  %v126_v39 = vperm.slane %v124_v38, 0  ;;  %v127_v46 = vperm.slane %v124_v38, 1  ;;  %v215_v53 = vld [vmem:[%s462_s6 + $0x20] sm:$0xff]  ;;  %v213_v55 = vld [vmem:[%s462_s6 + $0x10] sm:$0xff]  ;;  %v212_v56 = vld [vmem:[%s462_s6 + $0x8] sm:$0xff] }
  0x10   :  { %175 = vmatpush.msra.mxu0 %v144_v18  ;;  %236 = vmatpush.msrb.mxu2 %v217_v51  ;;  %v211_v57 = vld [vmem:[%s462_s6] sm:$0xff] }
  0x11   :  { %198 = vmatpush.msrb.mxu1 %v157_v26  ;;  %v259_v58 = vld [vmem:[%s461_s5] ss:$0 sm:$0xff] }
  0x12   :  { %176 = vmatpush.msra.mxu0 %v143_v19  ;;  %237 = vmatpush.msrb.mxu2 %v216_v52  ;;  %v260_v0 = vld [vmem:[%s464_s7] ss:$0 sm:$0xff] }
  0x13   :  { %199 = vmatpush.msrb.mxu1 %v156_v28 }
  0x14   :  { %177 = vmatpush.msra.mxu0 %v142_v20  ;;  %238 = vmatpush.msrb.mxu2 %v215_v53 }
  0x15   :  { %200 = vmatpush.msrb.mxu1 %v155_v30 }
  0x16   :  { %178 = vmatpush.msra.mxu0 %v141_v21  ;;  %239 = vmatpush.msrb.mxu2 %v214_v54 }
  0x17   :  { %201 = vmatpush.msrb.mxu1 %v154_v32 }
  0x18   :  { %179 = vmatpush.msra.mxu0 %v140_v22  ;;  %240 = vmatpush.msrb.mxu2 %v213_v55 }
  0x19   :  { %202 = vmatpush.msrb.mxu1 %v153_v33 }
  0x1a   :  { %180 = vmatpush.msra.mxu0 %v139_v23  ;;  %241 = vmatpush.msrb.mxu2 %v212_v56 }
  0x1b   :  { %203 = vmatpush.msrb.mxu1 %v152_v34 }
  0x1c   :  { %181 = vmatpush.msra.mxu0 %v138_v24  ;;  %242 = vmatpush.msrb.mxu2 %v211_v57 }
  0x1d   :  { %204 = vmatpush.msrb.mxu1 %v151_v35 }
  0x1e   :  { %182 = vmatpush.msra.mxu0 %v137_v25 }
  0x1f   :  { %205 = vmatpush.msrb.mxu1 %v150_v36 }
  0x20   :  { %183 = vmatpush.msra.mxu0 %v136_v27 }
  0x22   :  { %184 = vmatpush.msra.mxu0 %v135_v29 }
  0x24   :  { %185 = vmatpush.msra.mxu0 %v134_v31 }
  0x85   :  { %v75_v45 = vpop.f32.mrf.mxu1 }
  0x88   :  { %v55_v40 = vpop.f32.mrf.mxu3 }
  0x89   :  { %v99_v41 = vpop.f32.mrf.mxu2 }
  0x8a   :  { %v122_v42 = vmax.f32 %v55_v40, %v99_v41 }
  0x8c   :  { %v130_v43 = vadd.f32 %v126_v39, %v122_v42 }
  0x8e   :  { %v132_v44 = vmax.f32 %v130_v43, 0.0 }
  0x90   :  { %186 = vmatmul.f32.vlgmr.msra.gmra.mxu0 %v132_v44  ;;  %v119_v47 = vpop.f32.mrf.mxu3 }
  0x91   :  { %v123_v48 = vmax.f32 %v75_v45, %v119_v47 }
  0x93   :  { %v131_v49 = vadd.f32 %v127_v46, %v123_v48 }
  0x95   :  { %v133_v50 = vmax.f32 %v131_v49, 0.0 }
  0x97   :  { %257 = vmatmul.msk.f32.vlgmr.msrb.gmra.mxu1 %vm166_vm1, %v133_v50 }
 0x10d   :  { %v187_v59 = vpop.f32.mrf.mxu0 }
 0x10e   :  { %v188_v60 = vadd.f32 %v259_v58, %v187_v59 }
 0x114   :  { %v207_v61 = vpop.f32.mrf.mxu1 }
 0x115   :  { %v208_v62 = vadd.f32 %v207_v61, %v188_v60 }
 0x117   :  { %v210_v63 = vmax.f32 %v208_v62, 0.0 }
 0x119   :  { %258 = vmatmul.msk.f32.vlgmr.msrb.gmra.mxu2 %vm223_vm2, %v210_v63 }
 0x19c   :  { %v244_v1 = vpop.f32.mrf.mxu2 }
 0x19d   :  { %v245_v2 = vadd.f32 %v260_v0, %v244_v1 }
 0x19f   :  { %248 = vst.msk [vmem:[%s465_s8] sm:$0xff] %vm247_vm3, %v245_v2 }

</bundles_post_ra>
